<compile_context>
chip_gen: v5e
topology: v5e:2x2
jax: 0.10.0
libtpu: 0.0.40
codegen_flags: <defaults>
</compile_context>

<pallas_src>
import functools

import jax
import jax.numpy as jnp
from jax.experimental import pallas as pl
from jax.experimental.pallas import tpu as pltpu


def _round_up(n, m):
    return ((n + m - 1) // m) * m


def _cdiv(a, b):
    return -(-a // b)


def _tpu_generation():
    """Best-effort TPU generation from device_kind; defaults to 6 (recent)."""
    try:
        kind = jax.devices()[0].device_kind.lower()
    except Exception:
        kind = ""
    if any(t in kind for t in ("v7", "7x", "tpu7")):
        return 7
    if "v6" in kind:
        return 6
    if "v5" in kind:
        return 5
    return 6


def _classwise_loss_kernel(x_ref, ct_ref, nhcsq_ref, lab_ref, out_ref, *,
                           neg_half_sigma):
    x = x_ref[...]                        # (TB, Dp)  f32 or bf16 (streamed)
    c_t = ct_ref[...]                     # (Dp, Cp)  resident, sigma pre-folded
    nh_csq = nhcsq_ref[...]               # (1, Cp)   f32: -0.5*sigma*||c||^2 (-1e30 padded)
    labels = lab_ref[...]                 # (TB, 1)   int32, -1 for padded rows

    # -0.5*sigma*||x||^2  (always accumulated in f32)
    x_f32 = x.astype(jnp.float32)
    nh_xsq = neg_half_sigma * jnp.sum(x_f32 * x_f32, axis=1, keepdims=True)   # (TB, 1)

    # sigma * x . c^T on the MXU (canonical (M,K)@(K,N) layout, f32 accumulate)
    xc_s = jnp.dot(x, c_t, preferred_element_type=jnp.float32)                # (TB, Cp)

    # logits == -0.5 * sigma * distmat ; padded classes sit at ~-1e30.
    logits = xc_s + nh_xsq + nh_csq                                           # (TB, Cp)

    numer = jnp.exp(logits)                                                   # (TB, Cp)
    denom = jnp.sum(numer, axis=1, keepdims=True)                             # (TB, 1)

    classes = jax.lax.broadcasted_iota(jnp.int32, logits.shape, 1)            # (TB, Cp)
    mask = (labels == classes).astype(jnp.float32)                            # (TB, Cp)

    # Fold the mask BEFORE the log: only one class per row survives, so the
    # divide + log shrink from (TB, Cp) to (TB, 1) elements (EUP relief).
    numer_y = jnp.sum(mask * numer, axis=1, keepdims=True)                    # (TB, 1)
    row_valid = jnp.sum(mask, axis=1, keepdims=True)                          # 0 or 1
    ratio = numer_y / (denom + 1e-8)                                          # (TB, 1)
    dist_log = row_valid * jnp.log(ratio + 1e-8)                              # (TB, 1)
    partial = jnp.sum(dist_log)                                               # scalar

    # Lane-dense (8,128) output block; partial lives at [0,0], rest is zero,
    # so the wrapper can just sum the whole output array.
    row = jax.lax.broadcasted_iota(jnp.int32, (8, 128), 0)
    col = jax.lax.broadcasted_iota(jnp.int32, (8, 128), 1)
    out_ref[...] = jnp.where((row == 0) & (col == 0), partial, 0.0).astype(jnp.float32)


def classwise_loss(x, labels, centroids, *, inv_var=1.0, tile_b=None,
                   matmul_dtype=None):
    """x: (B, D) float, labels: (B,) int, centroids: (C, D) float -> scalar f32.

    matmul_dtype=jnp.bfloat16 enables bf16 MXU operands (f32 accumulation /
    f32 exp math) — ~4-8x matmul throughput at a small precision cost.
    """
    B, D = x.shape
    C, D2 = centroids.shape
    assert D == D2
    sigma = float(inv_var)
    gen = _tpu_generation()

    # ---- Padding geometry (generation aware) -------------------------------
    lane_c = 256 if gen >= 6 else 128          # v6e/v7x MXU is 2x256; v5e is 4x128
    D_pad = _round_up(D, 128)
    C_pad = _round_up(C, lane_c)

    # ---- Batch tile sizing --------------------------------------------------
    if tile_b is None:
        tile_b = 128 if gen >= 7 else 512      # v7x: 64 MiB VMEM; v5e/v6e: 128 MiB
    TB = max(8, min(int(tile_b), _round_up(B, 8)))
    TB = _round_up(TB, 8)

    # Prefer >=2 grid steps so the "parallel" batch axis can shard across the
    # two TensorCores on v7x (free ~2x for mid-sized batches).
    B8 = _round_up(B, 8)
    if B8 > 8 and _cdiv(B8, TB) < 2:
        TB = max(8, _round_up(_cdiv(B, 2), 8))

    # VMEM budget: resident centers (single buffer) + streamed x buffers +
    # (TB, C_pad) f32 temporaries must fit the generation's scoped limit.
    vmem_cap = (48 if gen >= 7 else 96) * 1024 * 1024
    op_dtype = jnp.dtype(matmul_dtype) if matmul_dtype is not None else jnp.dtype(x.dtype)
    itemsize = op_dtype.itemsize

    def _vmem_estimate(tb):
        centers = 1 * C_pad * D_pad * itemsize          # Buffered(1) resident block
        csq = 1 * C_pad * 4
        x_bufs = 3 if C_pad <= 512 else 2
        xs = x_bufs * tb * D_pad * itemsize
        lab = 2 * tb * 128 * 4                          # (TB,1) block, lane padded
        out = 2 * 8 * 128 * 4
        temps = 5 * tb * C_pad * 4                      # logits/numer/mask/iota/...
        return int(1.25 * (centers + csq + xs + lab + out + temps))

    while TB > 8 and _vmem_estimate(TB) > vmem_cap:
        TB = max(8, _round_up(TB // 2, 8))

    B_pad = _round_up(B, TB)
    num_tiles = B_pad // TB

    # ---- Host-side (one time) operand prep ---------------------------------
    x_p = jnp.zeros((B_pad, D_pad), x.dtype).at[:B, :D].set(x).astype(op_dtype)

    c_f32 = centroids.astype(jnp.float32)
    # Pre-transposed, sigma-folded resident centers: (D_pad, C_pad).
    c_t = (jnp.zeros((D_pad, C_pad), jnp.float32)
           .at[:D, :C].set((c_f32 * sigma).T)
           .astype(op_dtype))

    # -0.5*sigma*||c||^2 in f32; padded classes get -1e30 AFTER sigma scaling
    # so exp() underflows to exactly 0 for any inv_var (even 0).
    c_sq = jnp.sum(c_f32 * c_f32, axis=1)
    nh_csq = jnp.zeros((C_pad,), jnp.float32).at[:C].set(-0.5 * sigma * c_sq)
    nh_csq = jnp.where(jnp.arange(C_pad) < C, nh_csq, jnp.float32(-1e30))
    nh_csq = nh_csq.reshape(1, C_pad)

    labels_p = jnp.full((B_pad, 1), -1, jnp.int32).at[:B, 0].set(labels.astype(jnp.int32))

    kernel = functools.partial(_classwise_loss_kernel, neg_half_sigma=-0.5 * sigma)

    # ---- pallas_call (with fallback if pipeline_mode is unsupported) --------
    def _run(use_modes, vmem_bytes):
        if use_modes:
            const_mode = pl.Buffered(1)                       # resident blocks: 1 buffer
            x_mode = pl.Buffered(3) if C_pad <= 512 else None  # thin-compute regime
        else:
            const_mode = None
            x_mode = None

        def spec(shape, imap, mode=None):
            if mode is not None:
                return pl.BlockSpec(shape, imap, pipeline_mode=mode)
            return pl.BlockSpec(shape, imap)

        in_specs = [
            spec((TB, D_pad), lambda i: (i, 0), x_mode),        # x tile (streamed)
            spec((D_pad, C_pad), lambda i: (0, 0), const_mode),  # centers^T (resident)
            spec((1, C_pad), lambda i: (0, 0), const_mode),      # -0.5*sigma*||c||^2
            spec((TB, 1), lambda i: (i, 0), None),               # labels tile
        ]
        return pl.pallas_call(
            kernel,
            out_shape=jax.ShapeDtypeStruct((num_tiles * 8, 128), jnp.float32),
            grid_spec=pltpu.PrefetchScalarGridSpec(
                num_scalar_prefetch=0,
                grid=(num_tiles,),
                in_specs=in_specs,
                out_specs=pl.BlockSpec((8, 128), lambda i: (i, 0)),
            ),
            compiler_params=pltpu.CompilerParams(
                dimension_semantics=("parallel",),   # shard B tiles across TCs (v7x)
                vmem_limit_bytes=int(vmem_bytes),
            ),
        )(x_p, c_t, nh_csq, labels_p)

    try:
        partials = _run(use_modes=True, vmem_bytes=vmem_cap)
    except Exception:
        # Older jax without BlockSpec pipeline_mode, or a stricter VMEM cap:
        # fall back to default double-buffering and a conservative limit.
        partials = _run(use_modes=False, vmem_bytes=32 * 1024 * 1024)

    # Only [8*i, 0] of each tile block is non-zero, so a plain sum is exact.
    return -jnp.sum(partials) / jnp.float32(B)


def classwise_loss_ref(x, labels, centroids, *, inv_var=1.0):
    """Pure-JAX reference mirroring the PyTorch forward."""
    B = x.shape[0]
    C = centroids.shape[0]
    distmat = (jnp.sum(x ** 2, axis=1, keepdims=True)
               + jnp.sum(centroids ** 2, axis=1)[None, :]
               - 2.0 * x @ centroids.T)
    numer = jnp.exp(-0.5 * inv_var * distmat)
    denom = jnp.sum(numer, axis=1, keepdims=True)
    dist_div = numer / (denom + 1e-8)
    classes = jnp.arange(C)
    mask = (labels[:, None] == classes[None, :]).astype(jnp.float32)
    dist_log = jnp.log(dist_div + 1e-8) * mask
    return -jnp.sum(dist_log) / B


if __name__ == "__main__":
    num_classes = 16   # C
    bit_length = 32    # D (feat_dim)
    batch = 8          # B
    inv_var = 1.0

    key = jax.random.PRNGKey(0)
    kx, kc, kl = jax.random.split(key, 3)
    x = jax.random.normal(kx, (batch, bit_length), dtype=jnp.float32)
    # Deterministic synthetic "centers" parameter (torch.randn equivalent).
    centroids = jax.random.normal(kc, (num_classes, bit_length), dtype=jnp.float32)
    labels = jax.random.randint(kl, (batch,), 0, num_classes, dtype=jnp.int32)

    ref = classwise_loss_ref(x, labels, centroids, inv_var=inv_var)

    # f32 MXU path: matches the reference eps-for-eps (tight tolerance).
    loss = classwise_loss(x, labels, centroids, inv_var=inv_var)
    jax.block_until_ready(loss)
    assert jnp.allclose(loss, ref, rtol=5e-5, atol=5e-4), (loss, ref)

    # bf16 MXU path (production speed mode): documented precision trade,
    # so the tolerance is looser.
    loss_bf16 = classwise_loss(x, labels, centroids, inv_var=inv_var,
                               matmul_dtype=jnp.bfloat16)
    jax.block_until_ready(loss_bf16)
    assert bool(jnp.isfinite(loss_bf16))
    assert jnp.allclose(loss_bf16, ref, rtol=0.1, atol=0.5), (loss_bf16, ref)

    print("KERNEL_OK")
</pallas_src>

<mosaic_0001>
module attributes {stable_mosaic.version = 11 : i64} {
  func.func @_classwise_loss_kernel(%arg0: i32, %arg1: memref<8x128xf32, #tpu.memory_space<vmem>>, %arg2: memref<128x256xf32, #tpu.memory_space<vmem>>, %arg3: memref<1x256xf32, #tpu.memory_space<vmem>>, %arg4: memref<8x1xi32, #tpu.memory_space<vmem>>, %arg5: memref<8x128xf32, #tpu.memory_space<vmem>>) attributes {dimension_semantics = [#tpu.dimension_semantics<parallel>], iteration_bounds = array<i64: 1>, scalar_prefetch = 0 : i64, scratch_operands = 0 : i64, tpu.core_type = #tpu.core_type<tc>, window_params = [{transform_indices = @transform_0, window_bounds = array<i64: 8, 128>}, {pipeline_mode = #tpu.pipeline_mode<synchronous>, transform_indices = @transform_1, window_bounds = array<i64: 128, 256>}, {pipeline_mode = #tpu.pipeline_mode<synchronous>, transform_indices = @transform_2, window_bounds = array<i64: 1, 256>}, {transform_indices = @transform_3, window_bounds = array<i64: 8, 1>}, {transform_indices = @transform_4, window_bounds = array<i64: 8, 128>}]} {
    %c0 = arith.constant 0 : index
    %c0_0 = arith.constant 0 : index
    %0 = vector.load %arg1[%c0, %c0_0] : memref<8x128xf32, #tpu.memory_space<vmem>>, vector<8x128xf32>
    %c0_1 = arith.constant 0 : index
    %c0_2 = arith.constant 0 : index
    %1 = vector.load %arg2[%c0_1, %c0_2] : memref<128x256xf32, #tpu.memory_space<vmem>>, vector<128x256xf32>
    %c0_3 = arith.constant 0 : index
    %c0_4 = arith.constant 0 : index
    %2 = vector.load %arg3[%c0_3, %c0_4] : memref<1x256xf32, #tpu.memory_space<vmem>>, vector<1x256xf32>
    %c0_5 = arith.constant 0 : index
    %c0_6 = arith.constant 0 : index
    %3 = vector.load %arg4[%c0_5, %c0_6] : memref<8x1xi32, #tpu.memory_space<vmem>>, vector<8x1xi32>
    %4 = arith.mulf %0, %0 : vector<8x128xf32>
    %cst = arith.constant dense<0.000000e+00> : vector<8xf32>
    %5 = vector.multi_reduction <add>, %4, %cst [1] : vector<8x128xf32> to vector<8xf32>
    %6 = vector.shape_cast %5 : vector<8xf32> to vector<8x1xf32>
    %cst_7 = arith.constant -5.000000e-01 : f32
    %7 = vector.broadcast %cst_7 : f32 to vector<8x1xf32>
    %8 = arith.mulf %7, %6 : vector<8x1xf32>
    %cst_8 = arith.constant dense<0.000000e+00> : vector<8x256xf32>
    %9 = tpu.matmul %0, %1, %cst_8 {dimension_numbers = #tpu.dot_dimension_numbers<[1], [0], [0], [1], [0, 0, 1, 1], [], []>} : vector<8x128xf32>, vector<128x256xf32>, vector<8x256xf32> -> vector<8x256xf32>
    %10 = vector.broadcast %8 : vector<8x1xf32> to vector<8x256xf32>
    %11 = arith.addf %9, %10 : vector<8x256xf32>
    %12 = vector.broadcast %2 : vector<1x256xf32> to vector<8x256xf32>
    %13 = arith.addf %11, %12 : vector<8x256xf32>
    %14 = math.exp %13 : vector<8x256xf32>
    %cst_9 = arith.constant dense<0.000000e+00> : vector<8xf32>
    %15 = vector.multi_reduction <add>, %14, %cst_9 [1] : vector<8x256xf32> to vector<8xf32>
    %16 = vector.shape_cast %15 : vector<8xf32> to vector<8x1xf32>
    %17 = tpu.iota {dimensions = array<i32: 1>} : vector<8x256xi32>
    %18 = vector.broadcast %3 : vector<8x1xi32> to vector<8x256xi32>
    %19 = arith.cmpi eq, %18, %17 : vector<8x256xi32>
    %20 = arith.extui %19 : vector<8x256xi1> to vector<8x256xi32>
    %21 = arith.sitofp %20 : vector<8x256xi32> to vector<8x256xf32>
    %22 = arith.mulf %21, %14 : vector<8x256xf32>
    %cst_10 = arith.constant dense<0.000000e+00> : vector<8xf32>
    %23 = vector.multi_reduction <add>, %22, %cst_10 [1] : vector<8x256xf32> to vector<8xf32>
    %24 = vector.shape_cast %23 : vector<8xf32> to vector<8x1xf32>
    %cst_11 = arith.constant dense<0.000000e+00> : vector<8xf32>
    %25 = vector.multi_reduction <add>, %21, %cst_11 [1] : vector<8x256xf32> to vector<8xf32>
    %26 = vector.shape_cast %25 : vector<8xf32> to vector<8x1xf32>
    %cst_12 = arith.constant 9.99999993E-9 : f32
    %27 = vector.broadcast %cst_12 : f32 to vector<8x1xf32>
    %28 = arith.addf %16, %27 : vector<8x1xf32>
    %29 = arith.divf %24, %28 : vector<8x1xf32>
    %cst_13 = arith.constant 9.99999993E-9 : f32
    %30 = vector.broadcast %cst_13 : f32 to vector<8x1xf32>
    %31 = arith.addf %29, %30 : vector<8x1xf32>
    %32 = math.log %31 : vector<8x1xf32>
    %33 = arith.mulf %26, %32 : vector<8x1xf32>
    %34 = vector.shape_cast %33 : vector<8x1xf32> to vector<1x8x1xf32>
    %cst_14 = arith.constant dense<0.000000e+00> : vector<1xf32>
    %35 = vector.multi_reduction <add>, %34, %cst_14 [1, 2] : vector<1x8x1xf32> to vector<1xf32>
    %36 = vector.shape_cast %35 : vector<1xf32> to vector<1x1x1xf32>
    %37 = vector.extract %36[0, 0, 0] : f32 from vector<1x1x1xf32>
    %38 = tpu.iota {dimensions = array<i32: 0>} : vector<8x128xi32>
    %39 = tpu.iota {dimensions = array<i32: 1>} : vector<8x128xi32>
    %c0_i32 = arith.constant 0 : i32
    %40 = vector.broadcast %c0_i32 : i32 to vector<8x128xi32>
    %41 = arith.cmpi eq, %38, %40 : vector<8x128xi32>
    %c0_i32_15 = arith.constant 0 : i32
    %42 = vector.broadcast %c0_i32_15 : i32 to vector<8x128xi32>
    %43 = arith.cmpi eq, %39, %42 : vector<8x128xi32>
    %44 = arith.andi %41, %43 : vector<8x128xi1>
    %cst_16 = arith.constant 0.000000e+00 : f32
    %45 = vector.broadcast %37 : f32 to vector<8x128xf32>
    %46 = vector.broadcast %cst_16 : f32 to vector<8x128xf32>
    %47 = arith.select %44, %45, %46 : vector<8x128xi1>, vector<8x128xf32>
    %c0_17 = arith.constant 0 : index
    %c0_18 = arith.constant 0 : index
    %48 = vector.load %arg5[%c0_17, %c0_18] : memref<8x128xf32, #tpu.memory_space<vmem>>, vector<8x128xf32>
    tpu.vector_store %arg5[%c0_17, %c0_18], %47 {strides = array<i32>} : memref<8x128xf32, #tpu.memory_space<vmem>>, vector<8x128xf32>,
    return
  }
  func.func @transform_0(%arg0: i32) -> (i32, i32) {
    %c0_i32 = arith.constant 0 : i32
    %c0_i32_0 = arith.constant 0 : i32
    return %arg0, %c0_i32 : i32, i32
  }
  func.func @transform_1(%arg0: i32) -> (i32, i32) {
    %c0_i32 = arith.constant 0 : i32
    %c0_i32_0 = arith.constant 0 : i32
    %c0_i32_1 = arith.constant 0 : i32
    return %c0_i32, %c0_i32_0 : i32, i32
  }
  func.func @transform_2(%arg0: i32) -> (i32, i32) {
    %c0_i32 = arith.constant 0 : i32
    %c0_i32_0 = arith.constant 0 : i32
    %c0_i32_1 = arith.constant 0 : i32
    return %c0_i32, %c0_i32_0 : i32, i32
  }
  func.func @transform_3(%arg0: i32) -> (i32, i32) {
    %c0_i32 = arith.constant 0 : i32
    %c0_i32_0 = arith.constant 0 : i32
    return %arg0, %c0_i32 : i32, i32
  }
  func.func @transform_4(%arg0: i32) -> (i32, i32) {
    %c0_i32 = arith.constant 0 : i32
    %c0_i32_0 = arith.constant 0 : i32
    return %arg0, %c0_i32 : i32, i32
  }
}

</mosaic_0001>

<bundles_post_ra>
// kernel: tpu_custom_call.1
= control target key start
LH: loop header
LB: loop body
LE: loop exit
PB: predicated region body
PF: predicated region fallthrough
CT: control target
= control target key end

     0   :  { %9 = vsyncpa [#allocation3], 0  ;;  %s370_s0 = inlined_call_operand.vmem [shape: f32[8,128], index: 0, kind: input, shape index: {}]   ;;  %s371_s1 = inlined_call_operand.hbm [shape: f32[128,256], index: 1, kind: input, shape index: {}]   ;;  %s372_s2 = inlined_call_operand.hbm [shape: f32[1,256], index: 2, kind: input, shape index: {}]   ;;  %s373_s3 = inlined_call_operand.vmem [shape: s32[8,1], index: 3, kind: input, shape index: {}]   ;;  %s374_s4 = inlined_call_operand.hbm [shape: f32[8,128], index: 4, kind: output, shape index: {}]  }
   0x1   :  { %10 = vsyncpa [#allocation6], 0 }
   0x2   :  { %11 = vsyncpa [#allocation4], 0  ;;  %s18_s17 = sshll.u32 %s371_s1, 4  ;;  %s316_s18 = smov [#allocation2]   ;;  %s19_s17 = int_to_ptr.hbm [resolvable:$true] %s18_s17 }
   0x3   :  { %s20_s19 = sshll.u32 %s316_s18, 4  ;;  %s32_s22 = sshll.u32 %s372_s2, 4  ;;  %s21_s19 = int_to_ptr.vmem [resolvable:$true] %s20_s19  ;;  %s33_s22 = int_to_ptr.hbm [resolvable:$true] %s32_s22 }
   0x4   :  { %s317_s23 = smov 256   ;;  %s318_s24 = smov 16  }
   0x5   :  { %26 = dma.hbm_to_vmem [thread:$0]  %s19_s17, 4096, %s21_s19, [#allocation3], %s317_s23, %s317_s23, %s318_s24  }
   0x6   :  { %s319_s25 = smov [#allocation5]  }
   0x7   :  { %s34_s26 = sshll.u32 %s319_s25, 4  ;;  %s35_s26 = int_to_ptr.vmem [resolvable:$true] %s34_s26 }
   0x8   :  { %37 = dma.hbm_to_vmem [thread:$0]  %s33_s22, 32, %s35_s26, [#allocation6]  }
   0x9   :  { %310 = dma.done.wait [#allocation3], 4096  }
   0xa   :  { %311 = vsyncadd [#allocation3], 4294963200 }
   0xb   :  { %312 = dma.done.wait [#allocation6], 32  }
   0xc   :  { %313 = vsyncadd [#allocation6], 4294967264  ;;  %v79_v0 = vld [vmem:[#allocation2 + $0xf0] sm:$0xff]  ;;  %v80_v1 = vld [vmem:[#allocation2 + $0xf8] sm:$0xff]  ;;  %v320_v6 = vmov 0   ;;  %v141_v36 = vlaneseq  ;;  %v321_v41 = vmov 0.0  }
   0xd   :  { %v77_v2 = vld [vmem:[#allocation2 + $0xe0] sm:$0xff]  ;;  %87 = vmatpush.msra.mxu0 %v79_v0  ;;  %107 = vmatpush.msra.mxu1 %v80_v1  ;;  %v78_v3 = vld [vmem:[#allocation2 + $0xe8] sm:$0xff]  ;;  %v75_v4 = vld [vmem:[#allocation2 + $0xd0] sm:$0xff]  ;;  %vm181_vm6 = vcmask 7168   ;;  %s207_s5 = sshll.u32 %s374_s4, 4  ;;  %s208_s5 = int_to_ptr.hbm [resolvable:$true] %s207_s5 }
   0xe   :  { %v76_v5 = vld [vmem:[#allocation2 + $0xd8] sm:$0xff]  ;;  %229 = vset.pattern.permute.xlu0 %v320_v6  ;;  %v73_v7 = vld [vmem:[#allocation2 + $0xc0] sm:$0xff]  ;;  %v74_v8 = vld [vmem:[#allocation2 + $0xc8] sm:$0xff]  ;;  %v361_v38 = vand.u32 127, %v141_v36 }
   0xf   :  { %88 = vmatpush.msra.mxu0 %v77_v2  ;;  %108 = vmatpush.msra.mxu1 %v78_v3  ;;  %v71_v9 = vld [vmem:[#allocation2 + $0xb0] sm:$0xff]  ;;  %v72_v10 = vld [vmem:[#allocation2 + $0xb8] sm:$0xff]  ;;  %v69_v11 = vld [vmem:[#allocation2 + $0xa0] sm:$0xff] }
  0x10   :  { %v70_v12 = vld [vmem:[#allocation2 + $0xa8] sm:$0xff]  ;;  %v67_v13 = vld [vmem:[#allocation2 + $0x90] sm:$0xff]  ;;  %v68_v14 = vld [vmem:[#allocation2 + $0x98] sm:$0xff]  ;;  %v143_v39 = vadd.s32 128, %v361_v38  ;;  %vm195_vm8 = vcmp.eq.s32.totalorder %v361_v38, 0 }
  0x11   :  { %89 = vmatpush.msra.mxu0 %v75_v4  ;;  %109 = vmatpush.msra.mxu1 %v76_v5  ;;  %v48_v15 = vld [vmem:[%s370_s0] sm:$0xff]  ;;  %v66_v18 = vld [vmem:[#allocation2 + $0x88] sm:$0xff]  ;;  %v63_v19 = vld [vmem:[#allocation2 + $0x70] sm:$0xff] }
  0x12   :  { %v83_v16 = vmul.f32 %v48_v15, %v48_v15  ;;  %v65_v17 = vld [vmem:[#allocation2 + $0x80] sm:$0xff]  ;;  %v64_v20 = vld [vmem:[#allocation2 + $0x78] sm:$0xff]  ;;  %v62_v22 = vld [vmem:[#allocation2 + $0x68] sm:$0xff] }
  0x13   :  { %90 = vmatpush.msra.mxu0 %v73_v7  ;;  %110 = vmatpush.msra.mxu1 %v74_v8  ;;  %v61_v21 = vld [vmem:[#allocation2 + $0x60] sm:$0xff]  ;;  %v59_v23 = vld [vmem:[#allocation2 + $0x50] sm:$0xff]  ;;  %v60_v24 = vld [vmem:[#allocation2 + $0x58] sm:$0xff] }
  0x14   :  { %84 = vadd.xlane.f32.xlu0 %v83_v16  ;;  %v57_v25 = vld [vmem:[#allocation2 + $0x40] sm:$0xff]  ;;  %v58_v26 = vld [vmem:[#allocation2 + $0x48] sm:$0xff]  ;;  %v55_v27 = vld [vmem:[#allocation2 + $0x30] sm:$0xff] }
  0x15   :  { %91 = vmatpush.msra.mxu0 %v71_v9  ;;  %111 = vmatpush.msra.mxu1 %v72_v10  ;;  %v56_v28 = vld [vmem:[#allocation2 + $0x38] sm:$0xff]  ;;  %v53_v29 = vld [vmem:[#allocation2 + $0x20] sm:$0xff]  ;;  %v54_v30 = vld [vmem:[#allocation2 + $0x28] sm:$0xff] }
  0x16   :  { %v51_v31 = vld [vmem:[#allocation2 + $0x10] sm:$0xff]  ;;  %v52_v32 = vld [vmem:[#allocation2 + $0x18] sm:$0xff]  ;;  %v49_v33 = vld [vmem:[#allocation2] sm:$0xff] }
  0x17   :  { %92 = vmatpush.msra.mxu0 %v69_v11  ;;  %112 = vmatpush.msra.mxu1 %v70_v12  ;;  %v50_v34 = vld [vmem:[#allocation2 + $0x8] sm:$0xff]  ;;  %v82_v35 = vld [vmem:[%s373_s3] sm:$0xff]  ;;  %s322_s3 = smov [#allocation7]  }
  0x18   :  { %v81_v45 = vld [vmem:[#allocation5] sm:$0x3]  ;;  %s205_s28 = sshll.u32 %s322_s3, 4  ;;  %s206_s28 = int_to_ptr.vmem [resolvable:$true] %s205_s28 }
  0x19   :  { %93 = vmatpush.msra.mxu0 %v67_v13  ;;  %113 = vmatpush.msra.mxu1 %v68_v14  ;;  %v128_v47 = vperm.slane %v81_v45, 0  ;;  %v129_v48 = vperm.slane %v81_v45, 1 }
  0x1b   :  { %94 = vmatpush.msra.mxu0 %v65_v17  ;;  %114 = vmatpush.msra.mxu1 %v66_v18 }
  0x1d   :  { %95 = vmatpush.msra.mxu0 %v63_v19  ;;  %115 = vmatpush.msra.mxu1 %v64_v20 }
  0x1f   :  { %96 = vmatpush.msra.mxu0 %v61_v21  ;;  %116 = vmatpush.msra.mxu1 %v62_v22 }
  0x21   :  { %97 = vmatpush.msra.mxu0 %v59_v23  ;;  %117 = vmatpush.msra.mxu1 %v60_v24 }
  0x23   :  { %98 = vmatpush.msra.mxu0 %v57_v25  ;;  %118 = vmatpush.msra.mxu1 %v58_v26  ;;  %v193_v26 = vshrl.u32 %v141_v36, 7 }
  0x25   :  { %99 = vmatpush.msra.mxu0 %v55_v27  ;;  %119 = vmatpush.msra.mxu1 %v56_v28  ;;  %vm194_vm7 = vcmp.eq.s32.totalorder %v193_v26, 0 }
  0x26   :  { %vm196_vm9 = vmand %vm194_vm7, %vm195_vm8 }
  0x27   :  { %100 = vmatpush.msra.mxu0 %v53_v29  ;;  %120 = vmatpush.msra.mxu1 %v54_v30 }
  0x28   :  { %145 = vperm.xlu0 %229, %v82_v35  }
  0x29   :  { %101 = vmatpush.msra.mxu0 %v51_v31  ;;  %121 = vmatpush.msra.mxu1 %v52_v32 }
  0x2b   :  { %102 = vmatpush.msra.mxu0 %v49_v33  ;;  %122 = vmatpush.msra.mxu1 %v50_v34 }
  0x2c   :  { %103 = vmatmul.f32.vlgmr.msra.gmra.mxu0 %v48_v15  ;;  %123 = vmatmul.f32.vlgmr.msra.gmra.mxu1 %v48_v15 }
  0x87   :  { %v85_v37 = vpop.xlane.xlu0 %84 }
  0x88   :  { %v86_v46 = vmul.f32 -0.5, %v85_v37 }
  0x9a   :  { %v146_v40 = vpop.permute.xlu0 %145 }
  0x9b   :  { %vm147_vm0 = vcmp.eq.s32.totalorder %v146_v40, %v361_v38  ;;  %vm148_vm1 = vcmp.eq.s32.totalorder %v146_v40, %v143_v39 }
  0x9c   :  { %v218_v42 = vsel %vm147_vm0, 1.0, %v321_v41  ;;  %v219_v43 = vsel %vm148_vm1, 1.0, %v321_v41 }
  0x9d   :  { %v158_v44 = vadd.f32 %v219_v43, %v218_v42 }
  0x9f   :  { %159 = vadd.xlane.f32.xlu2 %v158_v44 }
  0xa9   :  { %v104_v49 = vpop.f32.mrf.mxu0  ;;  %v124_v50 = vpop.f32.mrf.mxu1 }
  0xaa   :  { %v105_v51 = vadd.f32 %v104_v49, %v86_v46  ;;  %v125_v52 = vadd.f32 %v124_v50, %v86_v46 }
  0xac   :  { %v132_v53 = vadd.f32 %v128_v47, %v105_v51  ;;  %v133_v54 = vadd.f32 %v129_v48, %v125_v52 }
  0xae   :  { %v134_v55 = vmul.f32 1.442695, %v132_v53  ;;  %v136_v56 = vmul.f32 1.442695, %v133_v54 }
  0xb0   :  { %230 = vpow2.f32 %v134_v55 }
  0xb1   :  { %232 = vpow2.f32 %v136_v56 }
  0xb6   :  { %v231_v57 = vpop.eup %230 }
  0xb7   :  { %v233_v58 = vpop.eup %232  ;;  %v153_v60 = vmul.f32 %v231_v57, %v218_v42 }
  0xb8   :  { %v138_v59 = vadd.f32 %v233_v58, %v231_v57  ;;  %v154_v61 = vmul.f32 %v233_v58, %v219_v43 }
  0xba   :  { %139 = vadd.xlane.f32.xlu1 %v138_v59  ;;  %v155_v62 = vadd.f32 %v154_v61, %v153_v60 }
  0xc2   :  { %156 = vadd.xlane.f32.xlu1 %v155_v62 }
 0x112   :  { %v160_v16 = vpop.xlane.xlu2 %159 }
 0x12d   :  { %v140_v63 = vpop.xlane.xlu1 %139 }
 0x12e   :  { %v161_v0 = vadd.f32 1e-08, %v140_v63 }
 0x130   :  { %234 = vrcp.f32 %v161_v0  ;;  %v173_v4 = vand.u32 2147483648, %v161_v0  ;;  %v171_v6 = vand.u32 2147483647, %v161_v0  ;;  %vm167_vm3 = vweird.f32 %v161_v0 }
 0x132   :  { %v174_v8 = vor.u32 1.1754944e-38, %v173_v4  ;;  %vm172_vm5 = vcmp.eq.f32.partialorder %v171_v6, 8.507059e+37 }
 0x135   :  { %v157_v11 = vpop.xlane.xlu1 %156 }
 0x136   :  { %v235_v1 = vpop.eup %234 }
 0x137   :  { %v163_v2 = vmul.f32 %v235_v1, %v161_v0  ;;  %vm168_vm2 = vweird.f32 %v235_v1 }
 0x138   :  { %vm169_vm4 = vmor %vm167_vm3, %vm168_vm2 }
 0x139   :  { %v164_v3 = vsub.f32 1.0, %v163_v2 }
 0x13b   :  { %v165_v5 = vmul.f32 %v235_v1, %v164_v3 }
 0x13d   :  { %v166_v7 = vadd.f32 %v235_v1, %v165_v5 }
 0x13f   :  { %v170_v9 = vsel %vm169_vm4, %v235_v1, %v166_v7 }
 0x140   :  { %v175_v10 = vsel %vm172_vm5, %v174_v8, %v170_v9 }
 0x141   :  { %v176_v12 = vmul.f32 %v175_v10, %v157_v11 }
 0x143   :  { %v177_v13 = vadd.f32 1e-08, %v176_v12 }
 0x145   :  { %236 = vlog2.f32 %v177_v13 }
 0x14b   :  { %v237_v14 = vpop.eup %236 }
 0x14c   :  { %v179_v15 = vmul.f32 0.6931472, %v237_v14 }
 0x14e   :  { %v180_v17 = vmul.f32 %v179_v15, %v160_v16 }
 0x150   :  { %v182_v18 = vsel %vm181_vm6, %v180_v17, 0.0 }
 0x151   :  { %183 = vadd.xlane.f32.xlu2 %v182_v18 }
 0x1c4   :  { %v184_v19 = vpop.xlane.xlu2 %183 }
 0x1c5   :  { %v185_v20 = vrot.slane %v184_v19, 4 }
 0x1c7   :  { %v186_v21 = vadd.f32 %v185_v20, %v184_v19 }
 0x1c9   :  { %v187_v22 = vrot.slane %v186_v21, 2 }
 0x1cb   :  { %v188_v23 = vadd.f32 %v187_v22, %v186_v21 }
 0x1cd   :  { %v189_v24 = vrot.slane %v188_v23, 1 }
 0x1cf   :  { %v190_v25 = vadd.f32 %v189_v24, %v188_v23 }
 0x1d1   :  { %220 = vpush %v190_v25 }
 0x202   :  { %s221_s6 = spop %220 }
 0x203   :  { %v197_v27 = vstv %s221_s6 }
 0x204   :  { %v198_v28 = vsel %vm196_vm9, %v197_v27, 0.0 }
 0x205   :  { %199 = vst [vmem:[#allocation7] sm:$0xff] %v198_v28 }
 0x206   :  { %210 = dma.vmem_to_hbm [thread:$0]  %s206_s28, 128, %s208_s5, [#allocation4]  }
 0x207   :  { %314 = dma.done.wait [#allocation4], 128  }
 0x208   :  { %315 = vsyncadd [#allocation4], 4294967168 }
 0x209   :  { %215 = vsyncpa [#allocation3], 1 }
 0x20a   :  { %216 = vsyncpa [#allocation6], 1 }
 0x20b   :  { %217 = vsyncpa [#allocation4], 1 }

</bundles_post_ra>
